<compile_context>
chip_gen: v5e
topology: v5e:2x2
jax: 0.10.0
libtpu: 0.0.40
codegen_flags: <defaults>
</compile_context>

<pallas_src>
import jax
import jax.numpy as jnp
from jax.experimental import pallas as pl
from jax.experimental.pallas import tpu as pltpu


def _round_up(n, m):
    return ((n + m - 1) // m) * m


def _vmem_limit_bytes():
    """Generation-aware VMEM budget: ~75% of physical, capped at 100 MiB.
    v5e/v6e (128 MiB physical) -> 96 MiB; v7x (64 MiB physical) -> 48 MiB."""
    try:
        cap = int(pltpu.get_tpu_info().vmem_capacity_bytes)
    except Exception:
        cap = 64 * 1024 * 1024
    return min((cap * 3) // 4, 100 * 1024 * 1024)


def _pick_row_tile(rows, max_tile):
    """Largest MXU-friendly row tile; if everything fits in one tile, split in two
    (>=8 rows each) so both v7x TensorCores get a grid step."""
    t = _round_up(rows, 8)
    if t <= max_tile:
        if t > 8:
            t = _round_up((t + 1) // 2, 8)
        return t
    return max_tile


# ----------------------------------------------------------------------------
# Kernel 1: synthetic "BERT" encoder head, fused gather + masked mean pool + pooler.
#   counts[r, v] = sum_s am[r, s] * [ids[r, s] == v]      (per-token (R,V) accum, no 3-D one-hot)
#   pooled[r, :] = (counts @ table)[r, :] * 1/denom       (MXU + EUP reciprocal)
#   out          = tanh(pooled @ W + b)                   (MXU + EUP)
# ----------------------------------------------------------------------------
def _encoder_kernel(ids_ref, am_ref, table_ref, w_ref, b_ref, o_ref):
    ids = ids_ref[...]                                   # (R, S) int32
    am = am_ref[...].astype(jnp.float32)                 # (R, S) f32 (cast in-kernel, free)
    R, S = ids.shape
    Vp = table_ref.shape[0]

    # Weighted token counts, one token column at a time: peak intermediate is (R, Vp),
    # never (R, S, Vp).  ids outside [0, Vp) silently contribute zero (unlike nn.Embedding).
    vidx = jax.lax.broadcasted_iota(jnp.int32, (R, Vp), 1)           # (R, Vp)
    counts = jnp.zeros((R, Vp), jnp.float32)
    for s in range(S):                                               # S is small & static
        counts = counts + jnp.where(ids[:, s:s + 1] == vidx, am[:, s:s + 1], 0.0)

    denom = jnp.maximum(jnp.sum(am, axis=1, keepdims=True), 1.0)     # (R, 1)
    inv_denom = pl.reciprocal(denom, approx=True)                    # EUP slot, ~free

    # Default-precision (single-pass bf16) MXU matmuls with f32 accumulation.
    pooled = jnp.dot(counts, table_ref[...],
                     preferred_element_type=jnp.float32) * inv_denom  # (R, H)
    proj = jnp.dot(pooled, w_ref[...],
                   preferred_element_type=jnp.float32) + b_ref[...]   # (R, H)
    o_ref[...] = jnp.tanh(proj)


_WEIGHT_SINGLE_BUFFER_OK = None  # lazily feature-detect pl.Buffered(1) support


def encode(ids, am, table, W, b, *, max_row_tile=256):
    """Encode `rows` sequences at once. ids/am: (rows, S) int32 -> (rows, H) f32."""
    rows, S = ids.shape
    Vp, H = table.shape
    tile = _pick_row_tile(rows, max_row_tile)
    rows_p = _round_up(rows, tile)
    if rows_p != rows:
        ids = jnp.pad(ids, ((0, rows_p - rows), (0, 0)))
        am = jnp.pad(am, ((0, rows_p - rows), (0, 0)))

    def call(single_buffer_weights):
        if single_buffer_weights:
            # Constant block index -> weights fetched once; single-buffer to halve footprint.
            wspec = lambda shp, im: pl.BlockSpec(shp, im, pipeline_mode=pl.Buffered(1))
        else:
            wspec = lambda shp, im: pl.BlockSpec(shp, im)
        return pl.pallas_call(
            _encoder_kernel,
            out_shape=jax.ShapeDtypeStruct((rows_p, H), jnp.float32),
            grid=(rows_p // tile,),
            in_specs=[
                pl.BlockSpec((tile, S), lambda i: (i, 0)),
                pl.BlockSpec((tile, S), lambda i: (i, 0)),
                wspec((Vp, H), lambda i: (0, 0)),
                wspec((H, H), lambda i: (0, 0)),
                wspec((1, H), lambda i: (0, 0)),
            ],
            out_specs=pl.BlockSpec((tile, H), lambda i: (i, 0)),
            compiler_params=pltpu.CompilerParams(
                dimension_semantics=("parallel",),
                vmem_limit_bytes=_vmem_limit_bytes(),
            ),
        )(ids, am, table, W, b)

    global _WEIGHT_SINGLE_BUFFER_OK
    if _WEIGHT_SINGLE_BUFFER_OK is None:
        try:
            out = call(True)
            _WEIGHT_SINGLE_BUFFER_OK = True
        except Exception:  # pl.Buffered(1) unsupported in this jax/Mosaic build
            _WEIGHT_SINGLE_BUFFER_OK = False
            out = call(False)
    else:
        out = call(_WEIGHT_SINGLE_BUFFER_OK)
    return out[:rows]


# ----------------------------------------------------------------------------
# Kernel 2: embs_dot_product
#   torch.bmm(q.unsqueeze(1), p.transpose(2, 1)).squeeze(1)
#   -> scores[b, d] = sum_h q[b, h] * p[b, d, h]
#   Done on VPU (broadcast-mul) + XLU (lane reduce) to avoid B tiny M=1 MXU pushes;
#   output last dim is padded to a lane-dense multiple of 128 (unmasked stores).
# ----------------------------------------------------------------------------
def _score_kernel(q_ref, p_ref, o_ref):
    q = q_ref[...]                                       # (Bt, H)
    p = p_ref[...]                                       # (Bt, Dp, H)
    o_ref[...] = jnp.sum(q[:, None, :] * p, axis=-1)     # (Bt, Dp)


def embs_dot_product(p_embs, q_emb, *, b_tile=8):
    B, D, H = p_embs.shape
    D_pad = _round_up(D, 128)          # lane-dense output; padded docs are zero -> score 0
    B_pad = _round_up(B, b_tile)
    if D_pad != D:
        p_embs = jnp.pad(p_embs, ((0, 0), (0, D_pad - D), (0, 0)))
    if B_pad != B:
        p_embs = jnp.pad(p_embs, ((0, B_pad - B), (0, 0), (0, 0)))
        q_emb = jnp.pad(q_emb, ((0, B_pad - B), (0, 0)))

    out = pl.pallas_call(
        _score_kernel,
        out_shape=jax.ShapeDtypeStruct((B_pad, D_pad), jnp.float32),
        grid=(B_pad // b_tile,),
        in_specs=[
            pl.BlockSpec((b_tile, H), lambda i: (i, 0)),
            pl.BlockSpec((b_tile, D_pad, H), lambda i: (i, 0, 0)),
        ],
        out_specs=pl.BlockSpec((b_tile, D_pad), lambda i: (i, 0)),
        compiler_params=pltpu.CompilerParams(
            dimension_semantics=("parallel",),
            vmem_limit_bytes=_vmem_limit_bytes(),
        ),
    )(q_emb, p_embs)
    return out[:B, :D]


# ----------------------------------------------------------------------------
# EmbeddingRetriever (forward == compute_embeddings; compute_score == bmm scoring)
# ----------------------------------------------------------------------------
class EmbeddingRetrieverPallas:
    def __init__(self, vocab_size, hidden, key):
        assert hidden % 128 == 0, "hidden must be a multiple of 128 (lane-dense)"
        vp = _round_up(vocab_size, 128)   # lane/K-dense vocab for the MXU contraction
        kq_emb, kq_w, kp_emb, kp_w = jax.random.split(key, 4)
        s = 1.0 / jnp.sqrt(hidden)

        def make_table(k):
            t = jax.random.normal(k, (vocab_size, hidden), jnp.float32) * s
            return jnp.pad(t, ((0, vp - vocab_size), (0, 0)))

        # question encoder params
        self.q_table = make_table(kq_emb)
        self.q_W = jax.random.normal(kq_w, (hidden, hidden), jnp.float32) * s
        self.q_b = jnp.zeros((1, hidden), jnp.float32)
        # paragraph encoder params
        self.p_table = make_table(kp_emb)
        self.p_W = jax.random.normal(kp_w, (hidden, hidden), jnp.float32) * s
        self.p_b = jnp.zeros((1, hidden), jnp.float32)

    @staticmethod
    def batch_passages(passages_list):
        """One-time conversion: list of D dicts of (B,S) -> dict of pre-batched (B,D,S)."""
        return {
            'ids': jnp.stack([p['ids'] for p in passages_list], axis=1),
            'am': jnp.stack([p['am'] for p in passages_list], axis=1),
        }

    def forward(self, question, passages):
        # == compute_embeddings ==
        if isinstance(passages, (list, tuple)):           # legacy list-of-dicts interface
            passages = self.batch_passages(passages)

        h_question = encode(question['ids'], question['am'],
                            self.q_table, self.q_W, self.q_b)            # (B, H)

        # All D paragraph encoder passes in ONE pallas_call over B*D rows; the reshape
        # (row index b*D + d) reproduces torch.stack(h_list, dim=1) exactly.
        B, D, S = passages['ids'].shape
        h_flat = encode(passages['ids'].reshape(B * D, S),
                        passages['am'].reshape(B * D, S),
                        self.p_table, self.p_W, self.p_b)                 # (B*D, H)
        h_paragraphs_batch = h_flat.reshape(B, D, -1)                     # (B, D, H)
        return h_question, h_paragraphs_batch

    def compute_score(self, question, passages):
        q_emb, p_embs = self.forward(question, passages)
        return embs_dot_product(p_embs, q_emb)                            # (B, D)


# ----------------------------------------------------------------------------
# Pure-JAX reference (module semantics: gather -> masked mean -> tanh(Wx+b) -> stack -> bmm)
# ----------------------------------------------------------------------------
def _ref_encode(ids, am, table, W, b):
    x = table[ids]                                                        # (R, S, H)
    amf = am.astype(jnp.float32)
    denom = jnp.maximum(jnp.sum(amf, axis=1, keepdims=True), 1.0)
    pooled = jnp.einsum('rs,rsh->rh', amf, x, precision='highest') / denom
    return jnp.tanh(jnp.dot(pooled, W, precision='highest') + b)


if __name__ == "__main__":
    key = jax.random.PRNGKey(0)
    k_model, k_qid, k_pid = jax.random.split(key, 3)

    # batch, seq, hidden (lane-dense 128), vocab, num_docs
    B, S, H, V, D = 2, 8, 128, 64, 3

    retriever = EmbeddingRetrieverPallas(V, H, k_model)

    question = {
        'ids': jax.random.randint(k_qid, (B, S), 0, V, dtype=jnp.int32),
        'am': jnp.ones((B, S), jnp.int32).at[:, S // 2:].set(0),
        'tt': jnp.zeros((B, S), jnp.int32),
    }
    # Passages pre-batched as (B, D, S) arrays (no per-forward host-side stacking).
    passages = {
        'ids': jax.random.randint(k_pid, (B, D, S), 0, V, dtype=jnp.int32),
        'am': jnp.ones((B, D, S), jnp.int32),
        'tt': jnp.zeros((B, D, S), jnp.int32),
    }

    # forward (== compute_embeddings) and compute_score
    h_q, h_p = retriever.forward(question, passages)
    scores = retriever.compute_score(question, passages)
    jax.block_until_ready((h_q, h_p, scores))

    # reference check
    ref_hq = _ref_encode(question['ids'], question['am'],
                         retriever.q_table, retriever.q_W, retriever.q_b)
    ref_hp = _ref_encode(passages['ids'].reshape(B * D, S),
                         passages['am'].reshape(B * D, S),
                         retriever.p_table, retriever.p_W, retriever.p_b).reshape(B, D, H)
    ref_scores = jnp.einsum('bh,bdh->bd', ref_hq, ref_hp, precision='highest')

    assert h_q.shape == (B, H)
    assert h_p.shape == (B, D, H)
    assert scores.shape == (B, D)
    assert jnp.allclose(h_q, ref_hq, atol=2e-3, rtol=2e-3), "question emb mismatch"
    assert jnp.allclose(h_p, ref_hp, atol=2e-3, rtol=2e-3), "paragraph emb mismatch"
    assert jnp.allclose(scores, ref_scores, atol=2e-3, rtol=2e-3), "score mismatch"

    print("KERNEL_OK")
</pallas_src>

<mosaic_0001>
module attributes {stable_mosaic.version = 11 : i64} {
  func.func @_encoder_kernel(%arg0: i32, %arg1: memref<8x8xi32, #tpu.memory_space<vmem>>, %arg2: memref<8x8xi32, #tpu.memory_space<vmem>>, %arg3: memref<128x128xf32, #tpu.memory_space<vmem>>, %arg4: memref<128x128xf32, #tpu.memory_space<vmem>>, %arg5: memref<1x128xf32, #tpu.memory_space<vmem>>, %arg6: memref<8x128xf32, #tpu.memory_space<vmem>>) attributes {dimension_semantics = [#tpu.dimension_semantics<parallel>], iteration_bounds = array<i64: 1>, scalar_prefetch = 0 : i64, scratch_operands = 0 : i64, tpu.core_type = #tpu.core_type<tc>, window_params = [{transform_indices = @transform_0, window_bounds = array<i64: 8, 8>}, {transform_indices = @transform_1, window_bounds = array<i64: 8, 8>}, {pipeline_mode = #tpu.pipeline_mode<synchronous>, transform_indices = @transform_2, window_bounds = array<i64: 128, 128>}, {pipeline_mode = #tpu.pipeline_mode<synchronous>, transform_indices = @transform_3, window_bounds = array<i64: 128, 128>}, {pipeline_mode = #tpu.pipeline_mode<synchronous>, transform_indices = @transform_4, window_bounds = array<i64: 1, 128>}, {transform_indices = @transform_5, window_bounds = array<i64: 8, 128>}]} {
    %c0 = arith.constant 0 : index
    %c0_0 = arith.constant 0 : index
    %0 = vector.load %arg1[%c0, %c0_0] : memref<8x8xi32, #tpu.memory_space<vmem>>, vector<8x8xi32>
    %c0_1 = arith.constant 0 : index
    %c0_2 = arith.constant 0 : index
    %1 = vector.load %arg2[%c0_1, %c0_2] : memref<8x8xi32, #tpu.memory_space<vmem>>, vector<8x8xi32>
    %2 = arith.sitofp %1 : vector<8x8xi32> to vector<8x8xf32>
    %3 = tpu.iota {dimensions = array<i32: 1>} : vector<8x128xi32>
    %cst = arith.constant 0.000000e+00 : f32
    %4 = vector.broadcast %cst : f32 to vector<8x128xf32>
    %5 = vector.extract_strided_slice %0 {offsets = [0, 0], sizes = [8, 1], strides = [1, 1]} : vector<8x8xi32> to vector<8x1xi32>
    %6 = vector.broadcast %5 : vector<8x1xi32> to vector<8x128xi32>
    %7 = arith.cmpi eq, %6, %3 : vector<8x128xi32>
    %8 = vector.extract_strided_slice %2 {offsets = [0, 0], sizes = [8, 1], strides = [1, 1]} : vector<8x8xf32> to vector<8x1xf32>
    %cst_3 = arith.constant 0.000000e+00 : f32
    %9 = vector.shape_cast %8 : vector<8x1xf32> to vector<8x1xf32>
    %10 = vector.broadcast %9 : vector<8x1xf32> to vector<8x128xf32>
    %11 = vector.broadcast %cst_3 : f32 to vector<8x128xf32>
    %12 = arith.select %7, %10, %11 : vector<8x128xi1>, vector<8x128xf32>
    %13 = arith.addf %4, %12 : vector<8x128xf32>
    %14 = vector.extract_strided_slice %0 {offsets = [0, 1], sizes = [8, 1], strides = [1, 1]} : vector<8x8xi32> to vector<8x1xi32>
    %15 = vector.broadcast %14 : vector<8x1xi32> to vector<8x128xi32>
    %16 = arith.cmpi eq, %15, %3 : vector<8x128xi32>
    %17 = vector.extract_strided_slice %2 {offsets = [0, 1], sizes = [8, 1], strides = [1, 1]} : vector<8x8xf32> to vector<8x1xf32>
    %cst_4 = arith.constant 0.000000e+00 : f32
    %18 = vector.shape_cast %17 : vector<8x1xf32> to vector<8x1xf32>
    %19 = vector.broadcast %18 : vector<8x1xf32> to vector<8x128xf32>
    %20 = vector.broadcast %cst_4 : f32 to vector<8x128xf32>
    %21 = arith.select %16, %19, %20 : vector<8x128xi1>, vector<8x128xf32>
    %22 = arith.addf %13, %21 : vector<8x128xf32>
    %23 = vector.extract_strided_slice %0 {offsets = [0, 2], sizes = [8, 1], strides = [1, 1]} : vector<8x8xi32> to vector<8x1xi32>
    %24 = vector.broadcast %23 : vector<8x1xi32> to vector<8x128xi32>
    %25 = arith.cmpi eq, %24, %3 : vector<8x128xi32>
    %26 = vector.extract_strided_slice %2 {offsets = [0, 2], sizes = [8, 1], strides = [1, 1]} : vector<8x8xf32> to vector<8x1xf32>
    %cst_5 = arith.constant 0.000000e+00 : f32
    %27 = vector.shape_cast %26 : vector<8x1xf32> to vector<8x1xf32>
    %28 = vector.broadcast %27 : vector<8x1xf32> to vector<8x128xf32>
    %29 = vector.broadcast %cst_5 : f32 to vector<8x128xf32>
    %30 = arith.select %25, %28, %29 : vector<8x128xi1>, vector<8x128xf32>
    %31 = arith.addf %22, %30 : vector<8x128xf32>
    %32 = vector.extract_strided_slice %0 {offsets = [0, 3], sizes = [8, 1], strides = [1, 1]} : vector<8x8xi32> to vector<8x1xi32>
    %33 = vector.broadcast %32 : vector<8x1xi32> to vector<8x128xi32>
    %34 = arith.cmpi eq, %33, %3 : vector<8x128xi32>
    %35 = vector.extract_strided_slice %2 {offsets = [0, 3], sizes = [8, 1], strides = [1, 1]} : vector<8x8xf32> to vector<8x1xf32>
    %cst_6 = arith.constant 0.000000e+00 : f32
    %36 = vector.shape_cast %35 : vector<8x1xf32> to vector<8x1xf32>
    %37 = vector.broadcast %36 : vector<8x1xf32> to vector<8x128xf32>
    %38 = vector.broadcast %cst_6 : f32 to vector<8x128xf32>
    %39 = arith.select %34, %37, %38 : vector<8x128xi1>, vector<8x128xf32>
    %40 = arith.addf %31, %39 : vector<8x128xf32>
    %41 = vector.extract_strided_slice %0 {offsets = [0, 4], sizes = [8, 1], strides = [1, 1]} : vector<8x8xi32> to vector<8x1xi32>
    %42 = vector.broadcast %41 : vector<8x1xi32> to vector<8x128xi32>
    %43 = arith.cmpi eq, %42, %3 : vector<8x128xi32>
    %44 = vector.extract_strided_slice %2 {offsets = [0, 4], sizes = [8, 1], strides = [1, 1]} : vector<8x8xf32> to vector<8x1xf32>
    %cst_7 = arith.constant 0.000000e+00 : f32
    %45 = vector.shape_cast %44 : vector<8x1xf32> to vector<8x1xf32>
    %46 = vector.broadcast %45 : vector<8x1xf32> to vector<8x128xf32>
    %47 = vector.broadcast %cst_7 : f32 to vector<8x128xf32>
    %48 = arith.select %43, %46, %47 : vector<8x128xi1>, vector<8x128xf32>
    %49 = arith.addf %40, %48 : vector<8x128xf32>
    %50 = vector.extract_strided_slice %0 {offsets = [0, 5], sizes = [8, 1], strides = [1, 1]} : vector<8x8xi32> to vector<8x1xi32>
    %51 = vector.broadcast %50 : vector<8x1xi32> to vector<8x128xi32>
    %52 = arith.cmpi eq, %51, %3 : vector<8x128xi32>
    %53 = vector.extract_strided_slice %2 {offsets = [0, 5], sizes = [8, 1], strides = [1, 1]} : vector<8x8xf32> to vector<8x1xf32>
    %cst_8 = arith.constant 0.000000e+00 : f32
    %54 = vector.shape_cast %53 : vector<8x1xf32> to vector<8x1xf32>
    %55 = vector.broadcast %54 : vector<8x1xf32> to vector<8x128xf32>
    %56 = vector.broadcast %cst_8 : f32 to vector<8x128xf32>
    %57 = arith.select %52, %55, %56 : vector<8x128xi1>, vector<8x128xf32>
    %58 = arith.addf %49, %57 : vector<8x128xf32>
    %59 = vector.extract_strided_slice %0 {offsets = [0, 6], sizes = [8, 1], strides = [1, 1]} : vector<8x8xi32> to vector<8x1xi32>
    %60 = vector.broadcast %59 : vector<8x1xi32> to vector<8x128xi32>
    %61 = arith.cmpi eq, %60, %3 : vector<8x128xi32>
    %62 = vector.extract_strided_slice %2 {offsets = [0, 6], sizes = [8, 1], strides = [1, 1]} : vector<8x8xf32> to vector<8x1xf32>
    %cst_9 = arith.constant 0.000000e+00 : f32
    %63 = vector.shape_cast %62 : vector<8x1xf32> to vector<8x1xf32>
    %64 = vector.broadcast %63 : vector<8x1xf32> to vector<8x128xf32>
    %65 = vector.broadcast %cst_9 : f32 to vector<8x128xf32>
    %66 = arith.select %61, %64, %65 : vector<8x128xi1>, vector<8x128xf32>
    %67 = arith.addf %58, %66 : vector<8x128xf32>
    %68 = vector.extract_strided_slice %0 {offsets = [0, 7], sizes = [8, 1], strides = [1, 1]} : vector<8x8xi32> to vector<8x1xi32>
    %69 = vector.broadcast %68 : vector<8x1xi32> to vector<8x128xi32>
    %70 = arith.cmpi eq, %69, %3 : vector<8x128xi32>
    %71 = vector.extract_strided_slice %2 {offsets = [0, 7], sizes = [8, 1], strides = [1, 1]} : vector<8x8xf32> to vector<8x1xf32>
    %cst_10 = arith.constant 0.000000e+00 : f32
    %72 = vector.shape_cast %71 : vector<8x1xf32> to vector<8x1xf32>
    %73 = vector.broadcast %72 : vector<8x1xf32> to vector<8x128xf32>
    %74 = vector.broadcast %cst_10 : f32 to vector<8x128xf32>
    %75 = arith.select %70, %73, %74 : vector<8x128xi1>, vector<8x128xf32>
    %76 = arith.addf %67, %75 : vector<8x128xf32>
    %cst_11 = arith.constant dense<0.000000e+00> : vector<8xf32>
    %77 = vector.multi_reduction <add>, %2, %cst_11 [1] : vector<8x8xf32> to vector<8xf32>
    %78 = vector.shape_cast %77 : vector<8xf32> to vector<8x1xf32>
    %cst_12 = arith.constant 1.000000e+00 : f32
    %79 = vector.broadcast %cst_12 : f32 to vector<8x1xf32>
    %80 = arith.maximumf %78, %79 : vector<8x1xf32>
    %81 = tpu.reciprocal %80 {approx = true} : vector<8x1xf32> -> vector<8x1xf32>
    %c0_13 = arith.constant 0 : index
    %c0_14 = arith.constant 0 : index
    %82 = vector.load %arg3[%c0_13, %c0_14] : memref<128x128xf32, #tpu.memory_space<vmem>>, vector<128x128xf32>
    %cst_15 = arith.constant dense<0.000000e+00> : vector<8x128xf32>
    %83 = tpu.matmul %76, %82, %cst_15 {dimension_numbers = #tpu.dot_dimension_numbers<[1], [0], [0], [1], [0, 0, 1, 1], [], []>} : vector<8x128xf32>, vector<128x128xf32>, vector<8x128xf32> -> vector<8x128xf32>
    %84 = vector.broadcast %81 : vector<8x1xf32> to vector<8x128xf32>
    %85 = arith.mulf %83, %84 : vector<8x128xf32>
    %c0_16 = arith.constant 0 : index
    %c0_17 = arith.constant 0 : index
    %86 = vector.load %arg4[%c0_16, %c0_17] : memref<128x128xf32, #tpu.memory_space<vmem>>, vector<128x128xf32>
    %cst_18 = arith.constant dense<0.000000e+00> : vector<8x128xf32>
    %87 = tpu.matmul %85, %86, %cst_18 {dimension_numbers = #tpu.dot_dimension_numbers<[1], [0], [0], [1], [0, 0, 1, 1], [], []>} : vector<8x128xf32>, vector<128x128xf32>, vector<8x128xf32> -> vector<8x128xf32>
    %c0_19 = arith.constant 0 : index
    %c0_20 = arith.constant 0 : index
    %88 = vector.load %arg5[%c0_19, %c0_20] : memref<1x128xf32, #tpu.memory_space<vmem>>, vector<1x128xf32>
    %89 = vector.broadcast %88 : vector<1x128xf32> to vector<8x128xf32>
    %90 = arith.addf %87, %89 : vector<8x128xf32>
    %91 = math.tanh %90 : vector<8x128xf32>
    %c0_21 = arith.constant 0 : index
    %c0_22 = arith.constant 0 : index
    %92 = vector.load %arg6[%c0_21, %c0_22] : memref<8x128xf32, #tpu.memory_space<vmem>>, vector<8x128xf32>
    tpu.vector_store %arg6[%c0_21, %c0_22], %91 {strides = array<i32>} : memref<8x128xf32, #tpu.memory_space<vmem>>, vector<8x128xf32>,
    return
  }
  func.func @transform_0(%arg0: i32) -> (i32, i32) {
    %c0_i32 = arith.constant 0 : i32
    %c0_i32_0 = arith.constant 0 : i32
    return %arg0, %c0_i32 : i32, i32
  }
  func.func @transform_1(%arg0: i32) -> (i32, i32) {
    %c0_i32 = arith.constant 0 : i32
    %c0_i32_0 = arith.constant 0 : i32
    return %arg0, %c0_i32 : i32, i32
  }
  func.func @transform_2(%arg0: i32) -> (i32, i32) {
    %c0_i32 = arith.constant 0 : i32
    %c0_i32_0 = arith.constant 0 : i32
    %c0_i32_1 = arith.constant 0 : i32
    return %c0_i32, %c0_i32_0 : i32, i32
  }
  func.func @transform_3(%arg0: i32) -> (i32, i32) {
    %c0_i32 = arith.constant 0 : i32
    %c0_i32_0 = arith.constant 0 : i32
    %c0_i32_1 = arith.constant 0 : i32
    return %c0_i32, %c0_i32_0 : i32, i32
  }
  func.func @transform_4(%arg0: i32) -> (i32, i32) {
    %c0_i32 = arith.constant 0 : i32
    %c0_i32_0 = arith.constant 0 : i32
    %c0_i32_1 = arith.constant 0 : i32
    return %c0_i32, %c0_i32_0 : i32, i32
  }
  func.func @transform_5(%arg0: i32) -> (i32, i32) {
    %c0_i32 = arith.constant 0 : i32
    %c0_i32_0 = arith.constant 0 : i32
    return %arg0, %c0_i32 : i32, i32
  }
}

module attributes {stable_mosaic.version = 11 : i64} {
  func.func @_encoder_kernel(%arg0: i32, %arg1: memref<8x8xi32, #tpu.memory_space<vmem>>, %arg2: memref<8x8xi32, #tpu.memory_space<vmem>>, %arg3: memref<128x128xf32, #tpu.memory_space<vmem>>, %arg4: memref<128x128xf32, #tpu.memory_space<vmem>>, %arg5: memref<1x128xf32, #tpu.memory_space<vmem>>, %arg6: memref<8x128xf32, #tpu.memory_space<vmem>>) attributes {dimension_semantics = [#tpu.dimension_semantics<parallel>], iteration_bounds = array<i64: 1>, scalar_prefetch = 0 : i64, scratch_operands = 0 : i64, tpu.core_type = #tpu.core_type<tc>, window_params = [{transform_indices = @transform_0, window_bounds = array<i64: 8, 8>}, {transform_indices = @transform_1, window_bounds = array<i64: 8, 8>}, {pipeline_mode = #tpu.pipeline_mode<synchronous>, transform_indices = @transform_2, window_bounds = array<i64: 128, 128>}, {pipeline_mode = #tpu.pipeline_mode<synchronous>, transform_indices = @transform_3, window_bounds = array<i64: 128, 128>}, {pipeline_mode = #tpu.pipeline_mode<synchronous>, transform_indices = @transform_4, window_bounds = array<i64: 1, 128>}, {transform_indices = @transform_5, window_bounds = array<i64: 8, 128>}]} {
    %c0 = arith.constant 0 : index
    %c0_0 = arith.constant 0 : index
    %0 = vector.load %arg1[%c0, %c0_0] : memref<8x8xi32, #tpu.memory_space<vmem>>, vector<8x8xi32>
    %c0_1 = arith.constant 0 : index
    %c0_2 = arith.constant 0 : index
    %1 = vector.load %arg2[%c0_1, %c0_2] : memref<8x8xi32, #tpu.memory_space<vmem>>, vector<8x8xi32>
    %2 = arith.sitofp %1 : vector<8x8xi32> to vector<8x8xf32>
    %3 = tpu.iota {dimensions = array<i32: 1>} : vector<8x128xi32>
    %cst = arith.constant 0.000000e+00 : f32
    %4 = vector.broadcast %cst : f32 to vector<8x128xf32>
    %5 = vector.extract_strided_slice %0 {offsets = [0, 0], sizes = [8, 1], strides = [1, 1]} : vector<8x8xi32> to vector<8x1xi32>
    %6 = vector.broadcast %5 : vector<8x1xi32> to vector<8x128xi32>
    %7 = arith.cmpi eq, %6, %3 : vector<8x128xi32>
    %8 = vector.extract_strided_slice %2 {offsets = [0, 0], sizes = [8, 1], strides = [1, 1]} : vector<8x8xf32> to vector<8x1xf32>
    %cst_3 = arith.constant 0.000000e+00 : f32
    %9 = vector.shape_cast %8 : vector<8x1xf32> to vector<8x1xf32>
    %10 = vector.broadcast %9 : vector<8x1xf32> to vector<8x128xf32>
    %11 = vector.broadcast %cst_3 : f32 to vector<8x128xf32>
    %12 = arith.select %7, %10, %11 : vector<8x128xi1>, vector<8x128xf32>
    %13 = arith.addf %4, %12 : vector<8x128xf32>
    %14 = vector.extract_strided_slice %0 {offsets = [0, 1], sizes = [8, 1], strides = [1, 1]} : vector<8x8xi32> to vector<8x1xi32>
    %15 = vector.broadcast %14 : vector<8x1xi32> to vector<8x128xi32>
    %16 = arith.cmpi eq, %15, %3 : vector<8x128xi32>
    %17 = vector.extract_strided_slice %2 {offsets = [0, 1], sizes = [8, 1], strides = [1, 1]} : vector<8x8xf32> to vector<8x1xf32>
    %cst_4 = arith.constant 0.000000e+00 : f32
    %18 = vector.shape_cast %17 : vector<8x1xf32> to vector<8x1xf32>
    %19 = vector.broadcast %18 : vector<8x1xf32> to vector<8x128xf32>
    %20 = vector.broadcast %cst_4 : f32 to vector<8x128xf32>
    %21 = arith.select %16, %19, %20 : vector<8x128xi1>, vector<8x128xf32>
    %22 = arith.addf %13, %21 : vector<8x128xf32>
    %23 = vector.extract_strided_slice %0 {offsets = [0, 2], sizes = [8, 1], strides = [1, 1]} : vector<8x8xi32> to vector<8x1xi32>
    %24 = vector.broadcast %23 : vector<8x1xi32> to vector<8x128xi32>
    %25 = arith.cmpi eq, %24, %3 : vector<8x128xi32>
    %26 = vector.extract_strided_slice %2 {offsets = [0, 2], sizes = [8, 1], strides = [1, 1]} : vector<8x8xf32> to vector<8x1xf32>
    %cst_5 = arith.constant 0.000000e+00 : f32
    %27 = vector.shape_cast %26 : vector<8x1xf32> to vector<8x1xf32>
    %28 = vector.broadcast %27 : vector<8x1xf32> to vector<8x128xf32>
    %29 = vector.broadcast %cst_5 : f32 to vector<8x128xf32>
    %30 = arith.select %25, %28, %29 : vector<8x128xi1>, vector<8x128xf32>
    %31 = arith.addf %22, %30 : vector<8x128xf32>
    %32 = vector.extract_strided_slice %0 {offsets = [0, 3], sizes = [8, 1], strides = [1, 1]} : vector<8x8xi32> to vector<8x1xi32>
    %33 = vector.broadcast %32 : vector<8x1xi32> to vector<8x128xi32>
    %34 = arith.cmpi eq, %33, %3 : vector<8x128xi32>
    %35 = vector.extract_strided_slice %2 {offsets = [0, 3], sizes = [8, 1], strides = [1, 1]} : vector<8x8xf32> to vector<8x1xf32>
    %cst_6 = arith.constant 0.000000e+00 : f32
    %36 = vector.shape_cast %35 : vector<8x1xf32> to vector<8x1xf32>
    %37 = vector.broadcast %36 : vector<8x1xf32> to vector<8x128xf32>
    %38 = vector.broadcast %cst_6 : f32 to vector<8x128xf32>
    %39 = arith.select %34, %37, %38 : vector<8x128xi1>, vector<8x128xf32>
    %40 = arith.addf %31, %39 : vector<8x128xf32>
    %41 = vector.extract_strided_slice %0 {offsets = [0, 4], sizes = [8, 1], strides = [1, 1]} : vector<8x8xi32> to vector<8x1xi32>
    %42 = vector.broadcast %41 : vector<8x1xi32> to vector<8x128xi32>
    %43 = arith.cmpi eq, %42, %3 : vector<8x128xi32>
    %44 = vector.extract_strided_slice %2 {offsets = [0, 4], sizes = [8, 1], strides = [1, 1]} : vector<8x8xf32> to vector<8x1xf32>
    %cst_7 = arith.constant 0.000000e+00 : f32
    %45 = vector.shape_cast %44 : vector<8x1xf32> to vector<8x1xf32>
    %46 = vector.broadcast %45 : vector<8x1xf32> to vector<8x128xf32>
    %47 = vector.broadcast %cst_7 : f32 to vector<8x128xf32>
    %48 = arith.select %43, %46, %47 : vector<8x128xi1>, vector<8x128xf32>
    %49 = arith.addf %40, %48 : vector<8x128xf32>
    %50 = vector.extract_strided_slice %0 {offsets = [0, 5], sizes = [8, 1], strides = [1, 1]} : vector<8x8xi32> to vector<8x1xi32>
    %51 = vector.broadcast %50 : vector<8x1xi32> to vector<8x128xi32>
    %52 = arith.cmpi eq, %51, %3 : vector<8x128xi32>
    %53 = vector.extract_strided_slice %2 {offsets = [0, 5], sizes = [8, 1], strides = [1, 1]} : vector<8x8xf32> to vector<8x1xf32>
    %cst_8 = arith.constant 0.000000e+00 : f32
    %54 = vector.shape_cast %53 : vector<8x1xf32> to vector<8x1xf32>
    %55 = vector.broadcast %54 : vector<8x1xf32> to vector<8x128xf32>
    %56 = vector.broadcast %cst_8 : f32 to vector<8x128xf32>
    %57 = arith.select %52, %55, %56 : vector<8x128xi1>, vector<8x128xf32>
    %58 = arith.addf %49, %57 : vector<8x128xf32>
    %59 = vector.extract_strided_slice %0 {offsets = [0, 6], sizes = [8, 1], strides = [1, 1]} : vector<8x8xi32> to vector<8x1xi32>
    %60 = vector.broadcast %59 : vector<8x1xi32> to vector<8x128xi32>
    %61 = arith.cmpi eq, %60, %3 : vector<8x128xi32>
    %62 = vector.extract_strided_slice %2 {offsets = [0, 6], sizes = [8, 1], strides = [1, 1]} : vector<8x8xf32> to vector<8x1xf32>
    %cst_9 = arith.constant 0.000000e+00 : f32
    %63 = vector.shape_cast %62 : vector<8x1xf32> to vector<8x1xf32>
    %64 = vector.broadcast %63 : vector<8x1xf32> to vector<8x128xf32>
    %65 = vector.broadcast %cst_9 : f32 to vector<8x128xf32>
    %66 = arith.select %61, %64, %65 : vector<8x128xi1>, vector<8x128xf32>
    %67 = arith.addf %58, %66 : vector<8x128xf32>
    %68 = vector.extract_strided_slice %0 {offsets = [0, 7], sizes = [8, 1], strides = [1, 1]} : vector<8x8xi32> to vector<8x1xi32>
    %69 = vector.broadcast %68 : vector<8x1xi32> to vector<8x128xi32>
    %70 = arith.cmpi eq, %69, %3 : vector<8x128xi32>
    %71 = vector.extract_strided_slice %2 {offsets = [0, 7], sizes = [8, 1], strides = [1, 1]} : vector<8x8xf32> to vector<8x1xf32>
    %cst_10 = arith.constant 0.000000e+00 : f32
    %72 = vector.shape_cast %71 : vector<8x1xf32> to vector<8x1xf32>
    %73 = vector.broadcast %72 : vector<8x1xf32> to vector<8x128xf32>
    %74 = vector.broadcast %cst_10 : f32 to vector<8x128xf32>
    %75 = arith.select %70, %73, %74 : vector<8x128xi1>, vector<8x128xf32>
    %76 = arith.addf %67, %75 : vector<8x128xf32>
    %cst_11 = arith.constant dense<0.000000e+00> : vector<8xf32>
    %77 = vector.multi_reduction <add>, %2, %cst_11 [1] : vector<8x8xf32> to vector<8xf32>
    %78 = vector.shape_cast %77 : vector<8xf32> to vector<8x1xf32>
    %cst_12 = arith.constant 1.000000e+00 : f32
    %79 = vector.broadcast %cst_12 : f32 to vector<8x1xf32>
    %80 = arith.maximumf %78, %79 : vector<8x1xf32>
    %81 = tpu.reciprocal %80 {approx = true} : vector<8x1xf32> -> vector<8x1xf32>
    %c0_13 = arith.constant 0 : index
    %c0_14 = arith.constant 0 : index
    %82 = vector.load %arg3[%c0_13, %c0_14] : memref<128x128xf32, #tpu.memory_space<vmem>>, vector<128x128xf32>
    %cst_15 = arith.constant dense<0.000000e+00> : vector<8x128xf32>
    %83 = tpu.matmul %76, %82, %cst_15 {dimension_numbers = #tpu.dot_dimension_numbers<[1], [0], [0], [1], [0, 0, 1, 1], [], []>} : vector<8x128xf32>, vector<128x128xf32>, vector<8x128xf32> -> vector<8x128xf32>
    %84 = vector.broadcast %81 : vector<8x1xf32> to vector<8x128xf32>
    %85 = arith.mulf %83, %84 : vector<8x128xf32>
    %c0_16 = arith.constant 0 : index
    %c0_17 = arith.constant 0 : index
    %86 = vector.load %arg4[%c0_16, %c0_17] : memref<128x128xf32, #tpu.memory_space<vmem>>, vector<128x128xf32>
    %cst_18 = arith.constant dense<0.000000e+00> : vector<8x128xf32>
    %87 = tpu.matmul %85, %86, %cst_18 {dimension_numbers = #tpu.dot_dimension_numbers<[1], [0], [0], [1], [0, 0, 1, 1], [], []>} : vector<8x128xf32>, vector<128x128xf32>, vector<8x128xf32> -> vector<8x128xf32>
    %c0_19 = arith.constant 0 : index
    %c0_20 = arith.constant 0 : index
    %88 = vector.load %arg5[%c0_19, %c0_20] : memref<1x128xf32, #tpu.memory_space<vmem>>, vector<1x128xf32>
    %89 = vector.broadcast %88 : vector<1x128xf32> to vector<8x128xf32>
    %90 = arith.addf %87, %89 : vector<8x128xf32>
    %91 = math.tanh %90 : vector<8x128xf32>
    %c0_21 = arith.constant 0 : index
    %c0_22 = arith.constant 0 : index
    %92 = vector.load %arg6[%c0_21, %c0_22] : memref<8x128xf32, #tpu.memory_space<vmem>>, vector<8x128xf32>
    tpu.vector_store %arg6[%c0_21, %c0_22], %91 {strides = array<i32>} : memref<8x128xf32, #tpu.memory_space<vmem>>, vector<8x128xf32>,
    return
  }
  func.func @transform_0(%arg0: i32) -> (i32, i32) {
    %c0_i32 = arith.constant 0 : i32
    %c0_i32_0 = arith.constant 0 : i32
    return %arg0, %c0_i32 : i32, i32
  }
  func.func @transform_1(%arg0: i32) -> (i32, i32) {
    %c0_i32 = arith.constant 0 : i32
    %c0_i32_0 = arith.constant 0 : i32
    return %arg0, %c0_i32 : i32, i32
  }
  func.func @transform_2(%arg0: i32) -> (i32, i32) {
    %c0_i32 = arith.constant 0 : i32
    %c0_i32_0 = arith.constant 0 : i32
    %c0_i32_1 = arith.constant 0 : i32
    return %c0_i32, %c0_i32_0 : i32, i32
  }
  func.func @transform_3(%arg0: i32) -> (i32, i32) {
    %c0_i32 = arith.constant 0 : i32
    %c0_i32_0 = arith.constant 0 : i32
    %c0_i32_1 = arith.constant 0 : i32
    return %c0_i32, %c0_i32_0 : i32, i32
  }
  func.func @transform_4(%arg0: i32) -> (i32, i32) {
    %c0_i32 = arith.constant 0 : i32
    %c0_i32_0 = arith.constant 0 : i32
    %c0_i32_1 = arith.constant 0 : i32
    return %c0_i32, %c0_i32_0 : i32, i32
  }
  func.func @transform_5(%arg0: i32) -> (i32, i32) {
    %c0_i32 = arith.constant 0 : i32
    %c0_i32_0 = arith.constant 0 : i32
    return %arg0, %c0_i32 : i32, i32
  }
}

</mosaic_0001>

<bundles_post_ra>
// kernel: tpu_custom_call.1
= control target key start
LH: loop header
LB: loop body
LE: loop exit
PB: predicated region body
PF: predicated region fallthrough
CT: control target
= control target key end

     0   :  { %10 = vsyncpa [#allocation3], 0  ;;  %s511_s0 = inlined_call_operand.hbm [shape: s32[8,8], index: 0, kind: input, shape index: {}]   ;;  %s512_s1 = inlined_call_operand.hbm [shape: s32[8,8], index: 1, kind: input, shape index: {}]   ;;  %s513_s2 = inlined_call_operand.hbm [shape: f32[128,128], index: 2, kind: input, shape index: {}]   ;;  %s514_s3 = inlined_call_operand.hbm [shape: f32[128,128], index: 3, kind: input, shape index: {}]   ;;  %s515_s4 = inlined_call_operand.vmem [shape: f32[1,128], index: 4, kind: input, shape index: {}]   ;;  %s516_s5 = inlined_call_operand.hbm [shape: f32[8,128], index: 5, kind: output, shape index: {}]  }
   0x1   :  { %11 = vsyncpa [#allocation6], 0 }
   0x2   :  { %12 = vsyncpa [#allocation9], 0  ;;  %s30_s20 = sshll.u32 %s512_s1, 4  ;;  %s31_s20 = int_to_ptr.hbm [resolvable:$true] %s30_s20 }
   0x3   :  { %13 = vsyncpa [#allocation4], 0  ;;  %s434_s21 = smov [#allocation5]   ;;  %s19_s25 = sshll.u32 %s511_s0, 4  ;;  %s20_s25 = int_to_ptr.hbm [resolvable:$true] %s19_s25 }
   0x4   :  { %s32_s22 = sshll.u32 %s434_s21, 4  ;;  %s435_s26 = smov [#allocation2]   ;;  %s33_s22 = int_to_ptr.vmem [resolvable:$true] %s32_s22 }
   0x5   :  { %35 = dma.hbm_to_vmem [thread:$0]  %s31_s20, 128, %s33_s22, [#allocation6]  }
   0x6   :  { %s21_s27 = sshll.u32 %s435_s26, 4  ;;  %s40_s30 = sshll.u32 %s513_s2, 4  ;;  %s22_s27 = int_to_ptr.vmem [resolvable:$true] %s21_s27  ;;  %s41_s30 = int_to_ptr.hbm [resolvable:$true] %s40_s30 }
   0x7   :  { %24 = dma.hbm_to_vmem [thread:$0]  %s20_s25, 128, %s22_s27, [#allocation3]  }
   0x8   :  { %s436_s1 = smov [#allocation7]   ;;  %s53_s9 = sshll.u32 %s514_s3, 4  ;;  %s54_s9 = int_to_ptr.hbm [resolvable:$true] %s53_s9 }
   0x9   :  { %s42_s6 = sshll.u32 %s436_s1, 4  ;;  %s437_s10 = smov 128   ;;  %s43_s6 = int_to_ptr.vmem [resolvable:$true] %s42_s6 }
   0xa   :  { %s438_s0 = smov 8   ;;  %s439_s11 = smov [#allocation8]  }
   0xb   :  { %48 = dma.hbm_to_vmem [thread:$0]  %s41_s30, 2048, %s43_s6, [#allocation6], %s437_s10, %s437_s10, %s438_s0  }
   0xc   :  { %s55_s12 = sshll.u32 %s439_s11, 4  ;;  %s56_s12 = int_to_ptr.vmem [resolvable:$true] %s55_s12 }
   0xd   :  { %61 = dma.hbm_to_vmem [thread:$0]  %s54_s9, 2048, %s56_s12, [#allocation9], %s437_s10, %s437_s10, %s438_s0  }
   0xe   :  { %426 = dma.done.wait [#allocation3], 128  }
   0xf   :  { %427 = vsyncadd [#allocation3], 4294967168 }
  0x10   :  { %428 = dma.done.wait [#allocation6], 2176  }
  0x11   :  { %429 = vsyncadd [#allocation6], 4294965120 }
  0x12   :  { %430 = dma.done.wait [#allocation9], 2048  }
  0x13   :  { %431 = vsyncadd [#allocation9], 4294965248  ;;  %v440_v0 = vmov 0   ;;  %v441_v1 = vmov 2   ;;  %v80_v2 = vld [vmem:[#allocation2] sm:$0xff]  ;;  %v81_v3 = vld [vmem:[#allocation5] sm:$0xff]  ;;  %v83_v37 = vlaneseq }
  0x14   :  { %285 = vset.pattern.permute.xlu0 %v440_v0  ;;  %288 = vset.pattern.permute.xlu1 %v440_v0  ;;  %v491_v4 = vcvt.s32.f32 %v81_v3  ;;  %v442_v5 = vmov 1   ;;  %v443_v6 = vmov 3   ;;  %v444_v7 = vmov 4   ;;  %v187_v11 = vld [vmem:[#allocation7 + $0x78] sm:$0xff]  ;;  %v186_v12 = vld [vmem:[#allocation7 + $0x70] sm:$0xff]  ;;  %v185_v13 = vld [vmem:[#allocation7 + $0x68] sm:$0xff] }
  0x15   :  { %287 = vset.pattern.permute.xlu2 %v441_v1  ;;  %86 = vperm.xlu0 %285, %v80_v2   ;;  %v445_v8 = vmov 5   ;;  %v446_v9 = vmov 6   ;;  %v447_v10 = vmov 7   ;;  %v184_v14 = vld [vmem:[#allocation7 + $0x60] sm:$0xff]  ;;  %v183_v15 = vld [vmem:[#allocation7 + $0x58] sm:$0xff]  ;;  %v182_v17 = vld [vmem:[#allocation7 + $0x50] sm:$0xff] }
  0x16   :  { %107 = vperm.xlu2 %287, %v80_v2   ;;  %91 = vperm.xlu1 %288, %v491_v4   ;;  %v181_v18 = vld [vmem:[#allocation7 + $0x48] sm:$0xff]  ;;  %v180_v19 = vld [vmem:[#allocation7 + $0x40] sm:$0xff]  ;;  %v179_v21 = vld [vmem:[#allocation7 + $0x38] sm:$0xff]  ;;  %vm166_vm0 = vcmask 64512   ;;  %v84_v41 = vand.u32 127, %v83_v37  ;;  %s448_s13 = smov [#allocation10]  }
  0x17   :  { %188 = vmatpush.msra.mxu0 %v187_v11  ;;  %v178_v22 = vld [vmem:[#allocation7 + $0x30] sm:$0xff]  ;;  %v177_v24 = vld [vmem:[#allocation7 + $0x28] sm:$0xff]  ;;  %v176_v25 = vld [vmem:[#allocation7 + $0x20] sm:$0xff]  ;;  %v167_v34 = vsel %vm166_vm0, %v491_v4, 0.0  ;;  %s256_s14 = sshll.u32 %s448_s13, 4  ;;  %s258_s17 = sshll.u32 %s516_s5, 4  ;;  %s257_s14 = int_to_ptr.vmem [resolvable:$true] %s256_s14  ;;  %s259_s17 = int_to_ptr.hbm [resolvable:$true] %s258_s17 }
  0x18   :  { %v175_v26 = vld [vmem:[#allocation7 + $0x18] sm:$0xff]  ;;  %v174_v28 = vld [vmem:[#allocation7 + $0x10] sm:$0xff]  ;;  %v173_v31 = vld [vmem:[#allocation7 + $0x8] sm:$0xff] }
  0x19   :  { %189 = vmatpush.msra.mxu0 %v186_v12  ;;  %v172_v32 = vld [vmem:[#allocation7] sm:$0xff]  ;;  %v224_v35 = vld [vmem:[#allocation8 + $0x78] sm:$0xff]  ;;  %v223_v36 = vld [vmem:[#allocation8 + $0x70] sm:$0xff] }
  0x1a   :  { %229 = vmatpush.msra.mxu1 %v224_v35  ;;  %v222_v38 = vld [vmem:[#allocation8 + $0x68] sm:$0xff]  ;;  %v221_v39 = vld [vmem:[#allocation8 + $0x60] sm:$0xff]  ;;  %v220_v43 = vld [vmem:[#allocation8 + $0x58] sm:$0xff] }
  0x1b   :  { %190 = vmatpush.msra.mxu0 %v185_v13  ;;  %v219_v44 = vld [vmem:[#allocation8 + $0x50] sm:$0xff]  ;;  %v218_v46 = vld [vmem:[#allocation8 + $0x48] sm:$0xff]  ;;  %v217_v48 = vld [vmem:[#allocation8 + $0x40] sm:$0xff] }
  0x1c   :  { %230 = vmatpush.msra.mxu1 %v223_v36  ;;  %v216_v52 = vld [vmem:[#allocation8 + $0x38] sm:$0xff]  ;;  %v215_v54 = vld [vmem:[#allocation8 + $0x30] sm:$0xff]  ;;  %v210_v11 = vld [vmem:[#allocation8 + $0x8] sm:$0xff] }
  0x1d   :  { %286 = vset.pattern.permute.xlu0 %v442_v5  ;;  %191 = vmatpush.msra.mxu0 %v184_v14  ;;  %v209_v12 = vld [vmem:[#allocation8] sm:$0xff] }
  0x1e   :  { %111 = vperm.xlu2 %287, %v491_v4   ;;  %97 = vperm.xlu0 %286, %v80_v2  }
  0x1f   :  { %289 = vset.pattern.permute.xlu1 %v442_v5  ;;  %192 = vmatpush.msra.mxu0 %v183_v15 }
  0x20   :  { %101 = vperm.xlu1 %289, %v491_v4   ;;  %231 = vmatpush.msra.mxu1 %v222_v38 }
  0x21   :  { %193 = vmatpush.msra.mxu0 %v182_v17 }
  0x22   :  { %232 = vmatpush.msra.mxu1 %v221_v39 }
  0x23   :  { %194 = vmatpush.msra.mxu0 %v181_v18  ;;  %v301_v18 = vld [vmem:[%s515_s4] ss:$0 sm:$0xff] }
  0x24   :  { %233 = vmatpush.msra.mxu1 %v220_v43 }
  0x25   :  { %195 = vmatpush.msra.mxu0 %v180_v19 }
  0x26   :  { %291 = vset.pattern.permute.xlu2 %v443_v6  ;;  %292 = vset.pattern.permute.xlu0 %v444_v7 }
  0x27   :  { %121 = vperm.xlu2 %291, %v491_v4   ;;  %127 = vperm.xlu0 %292, %v80_v2  }
  0x28   :  { %290 = vset.pattern.permute.xlu1 %v443_v6  ;;  %196 = vmatpush.msra.mxu0 %v179_v21 }
  0x29   :  { %117 = vperm.xlu1 %290, %v80_v2   ;;  %234 = vmatpush.msra.mxu1 %v219_v44 }
  0x2a   :  { %197 = vmatpush.msra.mxu0 %v178_v22 }
  0x2b   :  { %235 = vmatpush.msra.mxu1 %v218_v46 }
  0x2c   :  { %198 = vmatpush.msra.mxu0 %v177_v24 }
  0x2d   :  { %236 = vmatpush.msra.mxu1 %v217_v48 }
  0x2e   :  { %199 = vmatpush.msra.mxu0 %v176_v25 }
  0x2f   :  { %294 = vset.pattern.permute.xlu2 %v445_v8  ;;  %297 = vset.pattern.permute.xlu0 %v446_v9 }
  0x30   :  { %137 = vperm.xlu2 %294, %v80_v2   ;;  %151 = vperm.xlu0 %297, %v491_v4  }
  0x31   :  { %293 = vset.pattern.permute.xlu1 %v444_v7  ;;  %200 = vmatpush.msra.mxu0 %v175_v26  ;;  %v214_v7 = vld [vmem:[#allocation8 + $0x28] sm:$0xff] }
  0x32   :  { %131 = vperm.xlu1 %293, %v491_v4   ;;  %237 = vmatpush.msra.mxu1 %v216_v52 }
  0x33   :  { %201 = vmatpush.msra.mxu0 %v174_v28 }
  0x34   :  { %238 = vmatpush.msra.mxu1 %v215_v54 }
  0x35   :  { %202 = vmatpush.msra.mxu0 %v173_v31 }
  0x36   :  { %239 = vmatpush.msra.mxu1 %v214_v7 }
  0x37   :  { %203 = vmatpush.msra.mxu0 %v172_v32 }
  0x38   :  { %296 = vset.pattern.permute.xlu2 %v446_v9  ;;  %300 = vset.pattern.permute.xlu0 %v447_v10  ;;  %v212_v9 = vld [vmem:[#allocation8 + $0x18] sm:$0xff] }
  0x39   :  { %147 = vperm.xlu2 %296, %v80_v2  }
  0x3a   :  { %295 = vset.pattern.permute.xlu1 %v445_v8  ;;  %v213_v8 = vld [vmem:[#allocation8 + $0x20] sm:$0xff] }
  0x3b   :  { %141 = vperm.xlu1 %295, %v491_v4   ;;  %240 = vmatpush.msra.mxu1 %v213_v8 }
  0x3d   :  { %241 = vmatpush.msra.mxu1 %v212_v9 }
  0x41   :  { %299 = vset.pattern.permute.xlu2 %v447_v10 }
  0x42   :  { %161 = vperm.xlu2 %299, %v491_v4  }
  0x43   :  { %298 = vset.pattern.permute.xlu1 %v447_v10  ;;  %v211_v10 = vld [vmem:[#allocation8 + $0x10] sm:$0xff] }
  0x44   :  { %157 = vperm.xlu1 %298, %v80_v2   ;;  %242 = vmatpush.msra.mxu1 %v211_v10 }
  0x46   :  { %243 = vmatpush.msra.mxu1 %v210_v11 }
  0x48   :  { %244 = vmatpush.msra.mxu1 %v209_v12 }
  0x6e   :  { %168 = vadd.xlane.f32.xlu1 %v167_v34 }
  0x70   :  { %v501_v16 = vpop.permute.xlu2 %107 }
  0x71   :  { %vm109_vm3 = vcmp.eq.s32.totalorder %v501_v16, %v84_v41 }
  0x78   :  { %v112_v23 = vpop.permute.xlu2 %111 }
  0x79   :  { %v114_v55 = vsel %vm109_vm3, %v112_v23, 0.0 }
  0x81   :  { %v122_v30 = vpop.permute.xlu2 %121 }
  0x87   :  { %v87_v29 = vpop.permute.xlu0 %86 }
  0x88   :  { %v92_v20 = vpop.permute.xlu1 %91  ;;  %vm88_vm2 = vcmp.eq.s32.totalorder %v87_v29, %v84_v41 }
  0x89   :  { %v94_v49 = vsel %vm88_vm2, %v92_v20, 0.0 }
  0x8a   :  { %v138_v42 = vpop.permute.xlu2 %137 }
  0x8b   :  { %vm139_vm6 = vcmp.eq.s32.totalorder %v138_v42, %v84_v41 }
  0x90   :  { %v98_v40 = vpop.permute.xlu0 %97 }
  0x91   :  { %vm99_vm1 = vcmp.eq.s32.totalorder %v98_v40, %v84_v41 }
  0x92   :  { %v102_v27 = vpop.permute.xlu1 %101 }
  0x93   :  { %v104_v47 = vsel %vm99_vm1, %v102_v27, 0.0  ;;  %v148_v53 = vpop.permute.xlu2 %147 }
  0x94   :  { %v105_v51 = vadd.f32 %v104_v47, %v94_v49  ;;  %vm149_vm7 = vcmp.eq.s32.totalorder %v148_v53, %v84_v41 }
  0x96   :  { %v115_v57 = vadd.f32 %v114_v55, %v105_v51 }
  0x99   :  { %v128_v50 = vpop.permute.xlu0 %127 }
  0x9a   :  { %vm129_vm5 = vcmp.eq.s32.totalorder %v128_v50, %v84_v41 }
  0x9b   :  { %v118_v33 = vpop.permute.xlu1 %117 }
  0x9c   :  { %vm119_vm4 = vcmp.eq.s32.totalorder %v118_v33, %v84_v41  ;;  %v162_v2 = vpop.permute.xlu2 %161 }
  0x9d   :  { %v124_v56 = vsel %vm119_vm4, %v122_v30, 0.0 }
  0x9e   :  { %v125_v60 = vadd.f32 %v124_v56, %v115_v57 }
  0xa2   :  { %v152_v63 = vpop.permute.xlu0 %151 }
  0xa3   :  { %v154_v1 = vsel %vm149_vm7, %v152_v63, 0.0 }
  0xa4   :  { %v132_v45 = vpop.permute.xlu1 %131 }
  0xa5   :  { %v134_v59 = vsel %vm129_vm5, %v132_v45, 0.0 }
  0xa6   :  { %v135_v62 = vadd.f32 %v134_v59, %v125_v60 }
  0xad   :  { %v142_v58 = vpop.permute.xlu1 %141 }
  0xae   :  { %v144_v61 = vsel %vm139_vm6, %v142_v58, 0.0 }
  0xaf   :  { %v145_v0 = vadd.f32 %v144_v61, %v135_v62 }
  0xb1   :  { %v155_v4 = vadd.f32 %v154_v1, %v145_v0 }
  0xb6   :  { %v158_v3 = vpop.permute.xlu1 %157 }
  0xb7   :  { %vm159_vm8 = vcmp.eq.s32.totalorder %v158_v3, %v84_v41 }
  0xb8   :  { %v164_v5 = vsel %vm159_vm8, %v162_v2, 0.0 }
  0xb9   :  { %v165_v6 = vadd.f32 %v164_v5, %v155_v4 }
  0xbb   :  { %204 = vmatmul.f32.vlgmr.msra.gmra.mxu0 %v165_v6 }
  0xe1   :  { %v169_v13 = vpop.xlane.xlu1 %168 }
  0xe2   :  { %v170_v14 = vmax.f32 %v169_v13, 1.0 }
  0xe4   :  { %302 = vrcp.f32 %v170_v14 }
  0xea   :  { %v303_v15 = vpop.eup %302 }
 0x138   :  { %v205_v16 = vpop.f32.mrf.mxu0 }
 0x139   :  { %v208_v17 = vmul.f32 %v303_v15, %v205_v16 }
 0x13b   :  { %245 = vmatmul.f32.vlgmr.msra.gmra.mxu1 %v208_v17 }
 0x1b8   :  { %v246_v19 = vpop.f32.mrf.mxu1 }
 0x1b9   :  { %v247_v20 = vadd.f32 %v301_v18, %v246_v19 }
 0x1bb   :  { %304 = vtanh.f32 %v247_v20 }
 0x1c1   :  { %v305_v21 = vpop.eup %304 }
 0x1c2   :  { %250 = vst [vmem:[#allocation10] sm:$0xff] %v305_v21 }
 0x1c3   :  { %261 = dma.vmem_to_hbm [thread:$0]  %s257_s14, 128, %s259_s17, [#allocation4]  }
 0x1c4   :  { %432 = dma.done.wait [#allocation4], 128  }
 0x1c5   :  { %433 = vsyncadd [#allocation4], 4294967168 }
 0x1c6   :  { %266 = vsyncpa [#allocation3], 1 }
 0x1c7   :  { %267 = vsyncpa [#allocation6], 1 }
 0x1c8   :  { %268 = vsyncpa [#allocation9], 1 }
 0x1c9   :  { %269 = vsyncpa [#allocation4], 1 }

// kernel: tpu_custom_call.1
= control target key start
LH: loop header
LB: loop body
LE: loop exit
PB: predicated region body
PF: predicated region fallthrough
CT: control target
= control target key end

     0   :  { %10 = vsyncpa [#allocation3], 0  ;;  %s511_s0 = inlined_call_operand.hbm [shape: s32[8,8], index: 0, kind: input, shape index: {}]   ;;  %s512_s1 = inlined_call_operand.hbm [shape: s32[8,8], index: 1, kind: input, shape index: {}]   ;;  %s513_s2 = inlined_call_operand.hbm [shape: f32[128,128], index: 2, kind: input, shape index: {}]   ;;  %s514_s3 = inlined_call_operand.hbm [shape: f32[128,128], index: 3, kind: input, shape index: {}]   ;;  %s515_s4 = inlined_call_operand.vmem [shape: f32[1,128], index: 4, kind: input, shape index: {}]   ;;  %s516_s5 = inlined_call_operand.hbm [shape: f32[8,128], index: 5, kind: output, shape index: {}]  }
   0x1   :  { %11 = vsyncpa [#allocation6], 0 }
   0x2   :  { %12 = vsyncpa [#allocation9], 0  ;;  %s30_s20 = sshll.u32 %s512_s1, 4  ;;  %s31_s20 = int_to_ptr.hbm [resolvable:$true] %s30_s20 }
   0x3   :  { %13 = vsyncpa [#allocation4], 0  ;;  %s434_s21 = smov [#allocation5]   ;;  %s19_s25 = sshll.u32 %s511_s0, 4  ;;  %s20_s25 = int_to_ptr.hbm [resolvable:$true] %s19_s25 }
   0x4   :  { %s32_s22 = sshll.u32 %s434_s21, 4  ;;  %s435_s26 = smov [#allocation2]   ;;  %s33_s22 = int_to_ptr.vmem [resolvable:$true] %s32_s22 }
   0x5   :  { %35 = dma.hbm_to_vmem [thread:$0]  %s31_s20, 128, %s33_s22, [#allocation6]  }
   0x6   :  { %s21_s27 = sshll.u32 %s435_s26, 4  ;;  %s40_s30 = sshll.u32 %s513_s2, 4  ;;  %s22_s27 = int_to_ptr.vmem [resolvable:$true] %s21_s27  ;;  %s41_s30 = int_to_ptr.hbm [resolvable:$true] %s40_s30 }
   0x7   :  { %24 = dma.hbm_to_vmem [thread:$0]  %s20_s25, 128, %s22_s27, [#allocation3]  }
   0x8   :  { %s436_s1 = smov [#allocation7]   ;;  %s53_s9 = sshll.u32 %s514_s3, 4  ;;  %s54_s9 = int_to_ptr.hbm [resolvable:$true] %s53_s9 }
   0x9   :  { %s42_s6 = sshll.u32 %s436_s1, 4  ;;  %s437_s10 = smov 128   ;;  %s43_s6 = int_to_ptr.vmem [resolvable:$true] %s42_s6 }
   0xa   :  { %s438_s0 = smov 8   ;;  %s439_s11 = smov [#allocation8]  }
   0xb   :  { %48 = dma.hbm_to_vmem [thread:$0]  %s41_s30, 2048, %s43_s6, [#allocation6], %s437_s10, %s437_s10, %s438_s0  }
   0xc   :  { %s55_s12 = sshll.u32 %s439_s11, 4  ;;  %s56_s12 = int_to_ptr.vmem [resolvable:$true] %s55_s12 }
   0xd   :  { %61 = dma.hbm_to_vmem [thread:$0]  %s54_s9, 2048, %s56_s12, [#allocation9], %s437_s10, %s437_s10, %s438_s0  }
   0xe   :  { %426 = dma.done.wait [#allocation3], 128  }
   0xf   :  { %427 = vsyncadd [#allocation3], 4294967168 }
  0x10   :  { %428 = dma.done.wait [#allocation6], 2176  }
  0x11   :  { %429 = vsyncadd [#allocation6], 4294965120 }
  0x12   :  { %430 = dma.done.wait [#allocation9], 2048  }
  0x13   :  { %431 = vsyncadd [#allocation9], 4294965248  ;;  %v440_v0 = vmov 0   ;;  %v441_v1 = vmov 2   ;;  %v80_v2 = vld [vmem:[#allocation2] sm:$0xff]  ;;  %v81_v3 = vld [vmem:[#allocation5] sm:$0xff]  ;;  %v83_v37 = vlaneseq }
  0x14   :  { %285 = vset.pattern.permute.xlu0 %v440_v0  ;;  %288 = vset.pattern.permute.xlu1 %v440_v0  ;;  %v491_v4 = vcvt.s32.f32 %v81_v3  ;;  %v442_v5 = vmov 1   ;;  %v443_v6 = vmov 3   ;;  %v444_v7 = vmov 4   ;;  %v187_v11 = vld [vmem:[#allocation7 + $0x78] sm:$0xff]  ;;  %v186_v12 = vld [vmem:[#allocation7 + $0x70] sm:$0xff]  ;;  %v185_v13 = vld [vmem:[#allocation7 + $0x68] sm:$0xff] }
  0x15   :  { %287 = vset.pattern.permute.xlu2 %v441_v1  ;;  %86 = vperm.xlu0 %285, %v80_v2   ;;  %v445_v8 = vmov 5   ;;  %v446_v9 = vmov 6   ;;  %v447_v10 = vmov 7   ;;  %v184_v14 = vld [vmem:[#allocation7 + $0x60] sm:$0xff]  ;;  %v183_v15 = vld [vmem:[#allocation7 + $0x58] sm:$0xff]  ;;  %v182_v17 = vld [vmem:[#allocation7 + $0x50] sm:$0xff] }
  0x16   :  { %107 = vperm.xlu2 %287, %v80_v2   ;;  %91 = vperm.xlu1 %288, %v491_v4   ;;  %v181_v18 = vld [vmem:[#allocation7 + $0x48] sm:$0xff]  ;;  %v180_v19 = vld [vmem:[#allocation7 + $0x40] sm:$0xff]  ;;  %v179_v21 = vld [vmem:[#allocation7 + $0x38] sm:$0xff]  ;;  %vm166_vm0 = vcmask 64512   ;;  %v84_v41 = vand.u32 127, %v83_v37  ;;  %s448_s13 = smov [#allocation10]  }
  0x17   :  { %188 = vmatpush.msra.mxu0 %v187_v11  ;;  %v178_v22 = vld [vmem:[#allocation7 + $0x30] sm:$0xff]  ;;  %v177_v24 = vld [vmem:[#allocation7 + $0x28] sm:$0xff]  ;;  %v176_v25 = vld [vmem:[#allocation7 + $0x20] sm:$0xff]  ;;  %v167_v34 = vsel %vm166_vm0, %v491_v4, 0.0  ;;  %s256_s14 = sshll.u32 %s448_s13, 4  ;;  %s258_s17 = sshll.u32 %s516_s5, 4  ;;  %s257_s14 = int_to_ptr.vmem [resolvable:$true] %s256_s14  ;;  %s259_s17 = int_to_ptr.hbm [resolvable:$true] %s258_s17 }
  0x18   :  { %v175_v26 = vld [vmem:[#allocation7 + $0x18] sm:$0xff]  ;;  %v174_v28 = vld [vmem:[#allocation7 + $0x10] sm:$0xff]  ;;  %v173_v31 = vld [vmem:[#allocation7 + $0x8] sm:$0xff] }
  0x19   :  { %189 = vmatpush.msra.mxu0 %v186_v12  ;;  %v172_v32 = vld [vmem:[#allocation7] sm:$0xff]  ;;  %v224_v35 = vld [vmem:[#allocation8 + $0x78] sm:$0xff]  ;;  %v223_v36 = vld [vmem:[#allocation8 + $0x70] sm:$0xff] }
  0x1a   :  { %229 = vmatpush.msra.mxu1 %v224_v35  ;;  %v222_v38 = vld [vmem:[#allocation8 + $0x68] sm:$0xff]  ;;  %v221_v39 = vld [vmem:[#allocation8 + $0x60] sm:$0xff]  ;;  %v220_v43 = vld [vmem:[#allocation8 + $0x58] sm:$0xff] }
  0x1b   :  { %190 = vmatpush.msra.mxu0 %v185_v13  ;;  %v219_v44 = vld [vmem:[#allocation8 + $0x50] sm:$0xff]  ;;  %v218_v46 = vld [vmem:[#allocation8 + $0x48] sm:$0xff]  ;;  %v217_v48 = vld [vmem:[#allocation8 + $0x40] sm:$0xff] }
  0x1c   :  { %230 = vmatpush.msra.mxu1 %v223_v36  ;;  %v216_v52 = vld [vmem:[#allocation8 + $0x38] sm:$0xff]  ;;  %v215_v54 = vld [vmem:[#allocation8 + $0x30] sm:$0xff]  ;;  %v210_v11 = vld [vmem:[#allocation8 + $0x8] sm:$0xff] }
  0x1d   :  { %286 = vset.pattern.permute.xlu0 %v442_v5  ;;  %191 = vmatpush.msra.mxu0 %v184_v14  ;;  %v209_v12 = vld [vmem:[#allocation8] sm:$0xff] }
  0x1e   :  { %111 = vperm.xlu2 %287, %v491_v4   ;;  %97 = vperm.xlu0 %286, %v80_v2  }
  0x1f   :  { %289 = vset.pattern.permute.xlu1 %v442_v5  ;;  %192 = vmatpush.msra.mxu0 %v183_v15 }
  0x20   :  { %101 = vperm.xlu1 %289, %v491_v4   ;;  %231 = vmatpush.msra.mxu1 %v222_v38 }
  0x21   :  { %193 = vmatpush.msra.mxu0 %v182_v17 }
  0x22   :  { %232 = vmatpush.msra.mxu1 %v221_v39 }
  0x23   :  { %194 = vmatpush.msra.mxu0 %v181_v18  ;;  %v301_v18 = vld [vmem:[%s515_s4] ss:$0 sm:$0xff] }
  0x24   :  { %233 = vmatpush.msra.mxu1 %v220_v43 }
  0x25   :  { %195 = vmatpush.msra.mxu0 %v180_v19 }
  0x26   :  { %291 = vset.pattern.permute.xlu2 %v443_v6  ;;  %292 = vset.pattern.permute.xlu0 %v444_v7 }
  0x27   :  { %121 = vperm.xlu2 %291, %v491_v4   ;;  %127 = vperm.xlu0 %292, %v80_v2  }
  0x28   :  { %290 = vset.pattern.permute.xlu1 %v443_v6  ;;  %196 = vmatpush.msra.mxu0 %v179_v21 }
  0x29   :  { %117 = vperm.xlu1 %290, %v80_v2   ;;  %234 = vmatpush.msra.mxu1 %v219_v44 }
  0x2a   :  { %197 = vmatpush.msra.mxu0 %v178_v22 }
  0x2b   :  { %235 = vmatpush.msra.mxu1 %v218_v46 }
  0x2c   :  { %198 = vmatpush.msra.mxu0 %v177_v24 }
  0x2d   :  { %236 = vmatpush.msra.mxu1 %v217_v48 }
  0x2e   :  { %199 = vmatpush.msra.mxu0 %v176_v25 }
  0x2f   :  { %294 = vset.pattern.permute.xlu2 %v445_v8  ;;  %297 = vset.pattern.permute.xlu0 %v446_v9 }
  0x30   :  { %137 = vperm.xlu2 %294, %v80_v2   ;;  %151 = vperm.xlu0 %297, %v491_v4  }
  0x31   :  { %293 = vset.pattern.permute.xlu1 %v444_v7  ;;  %200 = vmatpush.msra.mxu0 %v175_v26  ;;  %v214_v7 = vld [vmem:[#allocation8 + $0x28] sm:$0xff] }
  0x32   :  { %131 = vperm.xlu1 %293, %v491_v4   ;;  %237 = vmatpush.msra.mxu1 %v216_v52 }
  0x33   :  { %201 = vmatpush.msra.mxu0 %v174_v28 }
  0x34   :  { %238 = vmatpush.msra.mxu1 %v215_v54 }
  0x35   :  { %202 = vmatpush.msra.mxu0 %v173_v31 }
  0x36   :  { %239 = vmatpush.msra.mxu1 %v214_v7 }
  0x37   :  { %203 = vmatpush.msra.mxu0 %v172_v32 }
  0x38   :  { %296 = vset.pattern.permute.xlu2 %v446_v9  ;;  %300 = vset.pattern.permute.xlu0 %v447_v10  ;;  %v212_v9 = vld [vmem:[#allocation8 + $0x18] sm:$0xff] }
  0x39   :  { %147 = vperm.xlu2 %296, %v80_v2  }
  0x3a   :  { %295 = vset.pattern.permute.xlu1 %v445_v8  ;;  %v213_v8 = vld [vmem:[#allocation8 + $0x20] sm:$0xff] }
  0x3b   :  { %141 = vperm.xlu1 %295, %v491_v4   ;;  %240 = vmatpush.msra.mxu1 %v213_v8 }
  0x3d   :  { %241 = vmatpush.msra.mxu1 %v212_v9 }
  0x41   :  { %299 = vset.pattern.permute.xlu2 %v447_v10 }
  0x42   :  { %161 = vperm.xlu2 %299, %v491_v4  }
  0x43   :  { %298 = vset.pattern.permute.xlu1 %v447_v10  ;;  %v211_v10 = vld [vmem:[#allocation8 + $0x10] sm:$0xff] }
  0x44   :  { %157 = vperm.xlu1 %298, %v80_v2   ;;  %242 = vmatpush.msra.mxu1 %v211_v10 }
  0x46   :  { %243 = vmatpush.msra.mxu1 %v210_v11 }
  0x48   :  { %244 = vmatpush.msra.mxu1 %v209_v12 }
  0x6e   :  { %168 = vadd.xlane.f32.xlu1 %v167_v34 }
  0x70   :  { %v501_v16 = vpop.permute.xlu2 %107 }
  0x71   :  { %vm109_vm3 = vcmp.eq.s32.totalorder %v501_v16, %v84_v41 }
  0x78   :  { %v112_v23 = vpop.permute.xlu2 %111 }
  0x79   :  { %v114_v55 = vsel %vm109_vm3, %v112_v23, 0.0 }
  0x81   :  { %v122_v30 = vpop.permute.xlu2 %121 }
  0x87   :  { %v87_v29 = vpop.permute.xlu0 %86 }
  0x88   :  { %v92_v20 = vpop.permute.xlu1 %91  ;;  %vm88_vm2 = vcmp.eq.s32.totalorder %v87_v29, %v84_v41 }
  0x89   :  { %v94_v49 = vsel %vm88_vm2, %v92_v20, 0.0 }
  0x8a   :  { %v138_v42 = vpop.permute.xlu2 %137 }
  0x8b   :  { %vm139_vm6 = vcmp.eq.s32.totalorder %v138_v42, %v84_v41 }
  0x90   :  { %v98_v40 = vpop.permute.xlu0 %97 }
  0x91   :  { %vm99_vm1 = vcmp.eq.s32.totalorder %v98_v40, %v84_v41 }
  0x92   :  { %v102_v27 = vpop.permute.xlu1 %101 }
  0x93   :  { %v104_v47 = vsel %vm99_vm1, %v102_v27, 0.0  ;;  %v148_v53 = vpop.permute.xlu2 %147 }
  0x94   :  { %v105_v51 = vadd.f32 %v104_v47, %v94_v49  ;;  %vm149_vm7 = vcmp.eq.s32.totalorder %v148_v53, %v84_v41 }
  0x96   :  { %v115_v57 = vadd.f32 %v114_v55, %v105_v51 }
  0x99   :  { %v128_v50 = vpop.permute.xlu0 %127 }
  0x9a   :  { %vm129_vm5 = vcmp.eq.s32.totalorder %v128_v50, %v84_v41 }
  0x9b   :  { %v118_v33 = vpop.permute.xlu1 %117 }
  0x9c   :  { %vm119_vm4 = vcmp.eq.s32.totalorder %v118_v33, %v84_v41  ;;  %v162_v2 = vpop.permute.xlu2 %161 }
  0x9d   :  { %v124_v56 = vsel %vm119_vm4, %v122_v30, 0.0 }
  0x9e   :  { %v125_v60 = vadd.f32 %v124_v56, %v115_v57 }
  0xa2   :  { %v152_v63 = vpop.permute.xlu0 %151 }
  0xa3   :  { %v154_v1 = vsel %vm149_vm7, %v152_v63, 0.0 }
  0xa4   :  { %v132_v45 = vpop.permute.xlu1 %131 }
  0xa5   :  { %v134_v59 = vsel %vm129_vm5, %v132_v45, 0.0 }
  0xa6   :  { %v135_v62 = vadd.f32 %v134_v59, %v125_v60 }
  0xad   :  { %v142_v58 = vpop.permute.xlu1 %141 }
  0xae   :  { %v144_v61 = vsel %vm139_vm6, %v142_v58, 0.0 }
  0xaf   :  { %v145_v0 = vadd.f32 %v144_v61, %v135_v62 }
  0xb1   :  { %v155_v4 = vadd.f32 %v154_v1, %v145_v0 }
  0xb6   :  { %v158_v3 = vpop.permute.xlu1 %157 }
  0xb7   :  { %vm159_vm8 = vcmp.eq.s32.totalorder %v158_v3, %v84_v41 }
  0xb8   :  { %v164_v5 = vsel %vm159_vm8, %v162_v2, 0.0 }
  0xb9   :  { %v165_v6 = vadd.f32 %v164_v5, %v155_v4 }
  0xbb   :  { %204 = vmatmul.f32.vlgmr.msra.gmra.mxu0 %v165_v6 }
  0xe1   :  { %v169_v13 = vpop.xlane.xlu1 %168 }
  0xe2   :  { %v170_v14 = vmax.f32 %v169_v13, 1.0 }
  0xe4   :  { %302 = vrcp.f32 %v170_v14 }
  0xea   :  { %v303_v15 = vpop.eup %302 }
 0x138   :  { %v205_v16 = vpop.f32.mrf.mxu0 }
 0x139   :  { %v208_v17 = vmul.f32 %v303_v15, %v205_v16 }
 0x13b   :  { %245 = vmatmul.f32.vlgmr.msra.gmra.mxu1 %v208_v17 }
 0x1b8   :  { %v246_v19 = vpop.f32.mrf.mxu1 }
 0x1b9   :  { %v247_v20 = vadd.f32 %v301_v18, %v246_v19 }
 0x1bb   :  { %304 = vtanh.f32 %v247_v20 }
 0x1c1   :  { %v305_v21 = vpop.eup %304 }
 0x1c2   :  { %250 = vst [vmem:[#allocation10] sm:$0xff] %v305_v21 }
 0x1c3   :  { %261 = dma.vmem_to_hbm [thread:$0]  %s257_s14, 128, %s259_s17, [#allocation4]  }
 0x1c4   :  { %432 = dma.done.wait [#allocation4], 128  }
 0x1c5   :  { %433 = vsyncadd [#allocation4], 4294967168 }
 0x1c6   :  { %266 = vsyncpa [#allocation3], 1 }
 0x1c7   :  { %267 = vsyncpa [#allocation6], 1 }
 0x1c8   :  { %268 = vsyncpa [#allocation9], 1 }
 0x1c9   :  { %269 = vsyncpa [#allocation4], 1 }

</bundles_post_ra>
